<compile_context>
chip_gen: v7x
topology: tpu7x:2x2x1
jax: 0.10.0
libtpu: 0.0.40
codegen_flags: <defaults>
</compile_context>

<pallas_src>
import functools
import math

import jax
import jax.numpy as jnp
from jax import lax
from jax.experimental import pallas as pl
from jax.experimental.pallas import tpu as pltpu


def _mha_kernel(h_ref, wqkv_ref, bqkv_ref, wo_ref, bo_ref, o_ref,
                qkv_scr, acc_ref, *, head_dim, head_dim_pad, kv_block,
                compute_dtype):
    """One grid step = (one batch element, one attention head)."""
    Dh = head_dim
    Dhp = head_dim_pad
    S = qkv_scr.shape[0]
    cd = compute_dtype
    f32 = jnp.float32
    hd = pl.program_id(1)

    # Zero the cross-head output-projection accumulator at the first head.
    @pl.when(hd == 0)
    def _init():
        acc_ref[...] = jnp.zeros_like(acc_ref)

    # ---- Per-head fused Q/K/V projection: (S, E) @ (E, 3*Dhp) on the MXU,
    # f32 accumulation.  The cast of h to compute dtype happens here on the
    # VPU (hidden under the MXU) instead of as a separate wrapper-side pass.
    h2d = h_ref[0].astype(cd)                                      # (S, E)
    qkv = jnp.dot(h2d, wqkv_ref[0],
                  preferred_element_type=f32) + bqkv_ref[0, 0]     # (S, 3*Dhp) f32

    # Write once into a lane-aligned compute-dtype VMEM scratch.  Q is
    # pre-scaled by 1/sqrt(Dh) here, so the kv loop has no per-block casts
    # and no per-block score scaling (both hoisted out of the inner loop).
    scale = 1.0 / math.sqrt(Dh)
    qkv_scr[:, :Dhp] = (qkv[:, :Dhp] * scale).astype(cd)           # Q (pre-scaled)
    qkv_scr[:, Dhp:] = qkv[:, Dhp:].astype(cd)                     # K, V

    q_h = qkv_scr[:, :Dhp]                                         # (S, Dhp) cd
    n_kv = S // kv_block

    # ---- Attention, tiled over the KEY axis.  The reference softmax is over
    # dim=1 == the QUERY axis, which stays fully resident per block, so every
    # key block is independent (no online rescaling).  NOTE: any future switch
    # to query tiling or dim=-1 softmax would require online rescaling.
    def kv_step(kb, head_acc):
        off = pl.multiple_of(kb * kv_block, kv_block)
        k_blk = qkv_scr[pl.ds(off, kv_block), Dhp:2 * Dhp]         # (kv, Dhp) cd
        v_blk = qkv_scr[pl.ds(off, kv_block), 2 * Dhp:3 * Dhp]     # (kv, Dhp) cd
        # scores[i, j] = <q_i, k_j> (already scaled): contraction on the head
        # dim (trans_b-style matmul, no explicit .T in value land).
        scores = lax.dot_general(q_h, k_blk, (((1,), (1,)), ((), ())),
                                 preferred_element_type=f32)       # (S, kv) f32
        # Softmax over axis 0 (query axis) == F.softmax(dim=1) in the module.
        m = jnp.max(scores, axis=0, keepdims=True)
        e = jnp.exp(scores - m)
        denom = jnp.sum(e, axis=0, keepdims=True)
        w = e * pl.reciprocal(denom, approx=False)                 # exact recip
        return head_acc + jnp.dot(w.astype(cd), v_blk,
                                  preferred_element_type=f32)      # (S, Dhp)

    head_out = lax.fori_loop(0, n_kv, kv_step,
                             jnp.zeros((S, Dhp), f32), unroll=True)

    # ---- Per-head contribution to the output projection.  Contraction is the
    # 128-lane-padded head dim; accumulated in f32 VMEM across the head axis.
    acc_ref[...] += jnp.dot(head_out.astype(cd), wo_ref[0],
                            preferred_element_type=f32)            # (S, E_pad)

    # Finalize at the last head: add bias, cast, one lane-dense store.
    @pl.when(hd == pl.num_programs(1) - 1)
    def _finalize():
        o_ref[0] = (acc_ref[...] + bo_ref[0]).astype(o_ref.dtype)


def multi_head_attention(h, wq, wk, wv, bq, bk, bv, wo, bo, *, num_heads,
                         kv_block=None, compute_dtype=jnp.bfloat16):
    """h: (B, S, E); wq/wk/wv: (E, H*Dh); wo: (H*Dh, E); biases: (1, dim)."""
    B, S, E = h.shape
    HDh = wq.shape[1]
    assert HDh % num_heads == 0
    Dh = HDh // num_heads

    # Lane-pad the per-head width and the output width to multiples of 128 so
    # all per-head slices and the final stores are vreg-aligned (no relayouts).
    Dhp = ((Dh + 127) // 128) * 128
    E_pad = ((E + 127) // 128) * 128

    # Key-axis tile: largest block <= 512 that divides S (key tiling is legal
    # because the softmax reduces over the fully resident query axis).
    if kv_block is None:
        kv_block = S
        for cand in (512, 256, 128):
            if S > cand and S % cand == 0:
                kv_block = cand
                break
    assert S % kv_block == 0

    f32 = jnp.float32

    # Head-major, 128-lane-padded fused QKV weights: (H, E, 3*Dhp), layout
    # [Q | K | V] per head.  Padded columns are zero, so padded q/k/v lanes
    # are exactly zero and never affect scores or outputs.
    def per_head_w(w):
        w3 = jnp.transpose(w.reshape(E, num_heads, Dh), (1, 0, 2))   # (H, E, Dh)
        return jnp.pad(w3, ((0, 0), (0, 0), (0, Dhp - Dh)))

    def per_head_b(b):
        b3 = b.reshape(num_heads, Dh)[:, None, :]                    # (H, 1, Dh)
        return jnp.pad(b3, ((0, 0), (0, 0), (0, Dhp - Dh)))

    wqkv = jnp.concatenate([per_head_w(wq), per_head_w(wk), per_head_w(wv)],
                           axis=2).astype(compute_dtype)             # (H, E, 3*Dhp)
    bqkv = jnp.concatenate([per_head_b(bq), per_head_b(bk), per_head_b(bv)],
                           axis=2).astype(f32)                       # (H, 1, 3*Dhp)

    # Per-head output-projection rows, sublane/lane padded: (H, Dhp, E_pad).
    wo_h = jnp.pad(wo.reshape(num_heads, Dh, E),
                   ((0, 0), (0, Dhp - Dh), (0, E_pad - E))).astype(compute_dtype)
    bo_p = jnp.pad(bo, ((0, 0), (0, E_pad - E))).astype(f32)         # (1, E_pad)

    kernel = functools.partial(
        _mha_kernel, head_dim=Dh, head_dim_pad=Dhp, kv_block=kv_block,
        compute_dtype=compute_dtype)

    # Per-generation VMEM budget (v5e/v6e: 128 MiB physical, v7x: 64 MiB).
    vmem_limit = 32 * 1024 * 1024
    try:
        cap = getattr(pltpu.get_tpu_info(), "vmem_capacity_bytes", None)
        if cap:
            vmem_limit = max(vmem_limit,
                             min(int(cap) * 3 // 4, 112 * 1024 * 1024))
    except Exception:
        pass

    itemsize = jnp.dtype(compute_dtype).itemsize
    flops = (2 * B * S * E * 3 * num_heads * Dhp        # per-head QKV projections
             + 4 * B * num_heads * S * S * Dhp          # scores + weights @ v
             + 2 * B * num_heads * S * Dhp * E_pad)     # output projection
    cost = pl.CostEstimate(
        flops=flops,
        transcendentals=B * num_heads * S * S,
        bytes_accessed=(h.size * h.dtype.itemsize
                        + B * (wqkv.size + wo_h.size) * itemsize
                        + B * (bqkv.size + bo_p.size) * 4
                        + B * S * E_pad * h.dtype.itemsize))

    out_p = pl.pallas_call(
        kernel,
        out_shape=jax.ShapeDtypeStruct((B, S, E_pad), h.dtype),
        grid_spec=pltpu.PrefetchScalarGridSpec(
            num_scalar_prefetch=0,
            grid=(B, num_heads),                      # (parallel batch, arbitrary head)
            in_specs=[
                pl.BlockSpec((1, S, E), lambda b, hd: (b, 0, 0)),         # h (f32)
                pl.BlockSpec((1, E, 3 * Dhp), lambda b, hd: (hd, 0, 0)),  # wqkv / head
                pl.BlockSpec((1, 1, 3 * Dhp), lambda b, hd: (hd, 0, 0)),  # bqkv / head
                pl.BlockSpec((1, Dhp, E_pad), lambda b, hd: (hd, 0, 0)),  # wo   / head
                pl.BlockSpec((1, E_pad), lambda b, hd: (0, 0)),           # bo
            ],
            out_specs=pl.BlockSpec((1, S, E_pad), lambda b, hd: (b, 0, 0)),
            scratch_shapes=[
                pltpu.VMEM((S, 3 * Dhp), compute_dtype),   # per-head Q/K/V
                pltpu.VMEM((S, E_pad), jnp.float32),       # output accumulator
            ],
        ),
        compiler_params=pltpu.CompilerParams(
            dimension_semantics=("parallel", "arbitrary"),
            vmem_limit_bytes=vmem_limit),
        cost_estimate=cost,
    )(h, wqkv, bqkv, wo_h, bo_p)

    return out_p[..., :E] if E_pad != E else out_p


def _reference(h, wq, wk, wv, bq, bk, bv, wo, bo, num_heads,
               compute_dtype=jnp.bfloat16):
    """Pure-JAX mirror of the PyTorch forward with the same precision policy
    (bf16 matmul operands, f32 accumulation, f32 softmax)."""
    Dh = wq.shape[1] // num_heads
    cd = compute_dtype
    f32 = jnp.float32

    def mm(a, w):
        return jnp.dot(a.astype(cd), w.astype(cd), preferred_element_type=f32)

    hc = h.astype(cd)
    q = mm(hc, wq) + bq
    k = mm(hc, wk) + bk
    v = mm(hc, wv) + bv
    outs = []
    for i in range(num_heads):
        lo, hi = i * Dh, (i + 1) * Dh
        qs, ks, vs = q[..., lo:hi], k[..., lo:hi], v[..., lo:hi]
        scores = jnp.einsum("bqd,bkd->bqk", qs.astype(cd), ks.astype(cd),
                            preferred_element_type=f32) / math.sqrt(Dh)
        weights = jax.nn.softmax(scores, axis=1)          # dim=1, per reference
        outs.append(jnp.einsum("bqk,bkd->bqd", weights.astype(cd),
                               vs.astype(cd), preferred_element_type=f32))
    cat = jnp.concatenate(outs, axis=-1)
    return mm(cat, wo) + bo


if __name__ == "__main__":
    # Small shapes consistent with the module: hidden_size=32, num_heads=4.
    B, S, E = 2, 8, 32
    num_heads = 4
    head_dim = E // num_heads

    key = jax.random.PRNGKey(0)
    ks = jax.random.split(key, 10)

    h = jax.random.normal(ks[0], (B, S, E), dtype=jnp.float32)

    # Per-head Linear weights concatenated along the output dim:
    # (E, num_heads*head_dim). Biases kept 2-D (1, dim) for TPU-friendly blocks.
    scale = 1.0 / math.sqrt(E)
    wq = jax.random.normal(ks[1], (E, num_heads * head_dim), jnp.float32) * scale
    wk = jax.random.normal(ks[2], (E, num_heads * head_dim), jnp.float32) * scale
    wv = jax.random.normal(ks[3], (E, num_heads * head_dim), jnp.float32) * scale
    bq = jax.random.normal(ks[4], (1, num_heads * head_dim), jnp.float32) * scale
    bk = jax.random.normal(ks[5], (1, num_heads * head_dim), jnp.float32) * scale
    bv = jax.random.normal(ks[6], (1, num_heads * head_dim), jnp.float32) * scale
    wo = jax.random.normal(ks[7], (num_heads * head_dim, E), jnp.float32) * scale
    bo = jax.random.normal(ks[8], (1, E), jnp.float32) * scale

    out = multi_head_attention(h, wq, wk, wv, bq, bk, bv, wo, bo,
                               num_heads=num_heads)
    out = jax.block_until_ready(out)

    ref = _reference(h, wq, wk, wv, bq, bk, bv, wo, bo, num_heads)
    assert out.shape == (B, S, E)
    assert jnp.allclose(out, ref, atol=2e-2, rtol=2e-2), "mismatch vs reference"

    print("KERNEL_OK")
</pallas_src>

<mosaic_0001>
module attributes {stable_mosaic.version = 11 : i64} {
  func.func @_mha_kernel(%arg0: i32, %arg1: i32, %arg2: memref<1x8x32xf32, #tpu.memory_space<vmem>>, %arg3: memref<1x32x384xbf16, #tpu.memory_space<vmem>>, %arg4: memref<1x1x384xf32, #tpu.memory_space<vmem>>, %arg5: memref<1x128x128xbf16, #tpu.memory_space<vmem>>, %arg6: memref<1x128xf32, #tpu.memory_space<vmem>>, %arg7: memref<1x8x128xf32, #tpu.memory_space<vmem>>, %arg8: memref<8x384xbf16, #tpu.memory_space<vmem>>, %arg9: memref<8x128xf32, #tpu.memory_space<vmem>>) attributes {dimension_semantics = [#tpu.dimension_semantics<parallel>, #tpu.dimension_semantics<arbitrary>], iteration_bounds = array<i64: 2, 4>, scalar_prefetch = 0 : i64, scratch_operands = 2 : i64, tpu.core_type = #tpu.core_type<tc>, window_params = [{transform_indices = @transform_0, window_bounds = array<i64: 1, 8, 32>}, {transform_indices = @transform_1, window_bounds = array<i64: 1, 32, 384>}, {transform_indices = @transform_2, window_bounds = array<i64: 1, 1, 384>}, {transform_indices = @transform_3, window_bounds = array<i64: 1, 128, 128>}, {pipeline_mode = #tpu.pipeline_mode<synchronous>, transform_indices = @transform_4, window_bounds = array<i64: 1, 128>}, {transform_indices = @transform_5, window_bounds = array<i64: 1, 8, 128>}]} {
    %c0_i32 = arith.constant 0 : i32
    %0 = arith.cmpi eq, %arg1, %c0_i32 : i32
    %1 = arith.extui %0 : i1 to i32
    %c0_i32_0 = arith.constant 0 : i32
    %2 = arith.cmpi ne, %1, %c0_i32_0 : i32
    scf.if %2 {
      %cst_31 = arith.constant 0.000000e+00 : f32
      %54 = vector.broadcast %cst_31 : f32 to vector<8x128xf32>
      %c0_32 = arith.constant 0 : index
      %c0_33 = arith.constant 0 : index
      %55 = vector.load %arg9[%c0_32, %c0_33] : memref<8x128xf32, #tpu.memory_space<vmem>>, vector<8x128xf32>
      tpu.vector_store %arg9[%c0_32, %c0_33], %54 {strides = array<i32>} : memref<8x128xf32, #tpu.memory_space<vmem>>, vector<8x128xf32>,
    } else {
    }
    %c0 = arith.constant 0 : index
    %c0_1 = arith.constant 0 : index
    %c0_2 = arith.constant 0 : index
    %3 = vector.load %arg2[%c0, %c0_1, %c0_2] : memref<1x8x32xf32, #tpu.memory_space<vmem>>, vector<1x8x32xf32>
    %4 = vector.shape_cast %3 : vector<1x8x32xf32> to vector<8x32xf32>
    %5 = arith.truncf %4 : vector<8x32xf32> to vector<8x32xbf16>
    %c0_3 = arith.constant 0 : index
    %c0_4 = arith.constant 0 : index
    %c0_5 = arith.constant 0 : index
    %6 = vector.load %arg3[%c0_3, %c0_4, %c0_5] : memref<1x32x384xbf16, #tpu.memory_space<vmem>>, vector<1x32x384xbf16>
    %7 = vector.shape_cast %6 : vector<1x32x384xbf16> to vector<32x384xbf16>
    %cst = arith.constant dense<0.000000e+00> : vector<8x384xf32>
    %8 = tpu.matmul %5, %7, %cst {dimension_numbers = #tpu.dot_dimension_numbers<[1], [0], [0], [1], [0, 0, 1, 1], [], []>} : vector<8x32xbf16>, vector<32x384xbf16>, vector<8x384xf32> -> vector<8x384xf32>
    %c0_6 = arith.constant 0 : index
    %c0_7 = arith.constant 0 : index
    %c0_8 = arith.constant 0 : index
    %9 = vector.load %arg4[%c0_6, %c0_7, %c0_8] : memref<1x1x384xf32, #tpu.memory_space<vmem>>, vector<1x1x384xf32>
    %10 = vector.shape_cast %9 : vector<1x1x384xf32> to vector<384xf32>
    %11 = vector.shape_cast %10 : vector<384xf32> to vector<1x384xf32>
    %12 = vector.broadcast %11 : vector<1x384xf32> to vector<8x384xf32>
    %13 = arith.addf %8, %12 : vector<8x384xf32>
    %14 = vector.extract_strided_slice %13 {offsets = [0, 0], sizes = [8, 128], strides = [1, 1]} : vector<8x384xf32> to vector<8x128xf32>
    %cst_9 = arith.constant 0.353553385 : f32
    %15 = vector.broadcast %cst_9 : f32 to vector<8x128xf32>
    %16 = arith.mulf %14, %15 : vector<8x128xf32>
    %17 = arith.truncf %16 : vector<8x128xf32> to vector<8x128xbf16>
    %c0_10 = arith.constant 0 : index
    %c0_11 = arith.constant 0 : index
    %18 = vector.load %arg8[%c0_10, %c0_11] : memref<8x384xbf16, #tpu.memory_space<vmem>>, vector<8x128xbf16>
    tpu.vector_store %arg8[%c0_10, %c0_11], %17 {strides = array<i32>} : memref<8x384xbf16, #tpu.memory_space<vmem>>, vector<8x128xbf16>,
    %19 = vector.extract_strided_slice %13 {offsets = [0, 128], sizes = [8, 256], strides = [1, 1]} : vector<8x384xf32> to vector<8x256xf32>
    %20 = arith.truncf %19 : vector<8x256xf32> to vector<8x256xbf16>
    %c0_12 = arith.constant 0 : index
    %c128 = arith.constant 128 : index
    %21 = vector.load %arg8[%c0_12, %c128] : memref<8x384xbf16, #tpu.memory_space<vmem>>, vector<8x256xbf16>
    tpu.vector_store %arg8[%c0_12, %c128], %20 {strides = array<i32>} : memref<8x384xbf16, #tpu.memory_space<vmem>>, vector<8x256xbf16>,
    %c0_13 = arith.constant 0 : index
    %c0_14 = arith.constant 0 : index
    %22 = vector.load %arg8[%c0_13, %c0_14] : memref<8x384xbf16, #tpu.memory_space<vmem>>, vector<8x128xbf16>
    %cst_15 = arith.constant 0.000000e+00 : f32
    %23 = vector.broadcast %cst_15 : f32 to vector<8x128xf32>
    %c0_i32_16 = arith.constant 0 : i32
    %c8_i32 = arith.constant 8 : i32
    %24 = arith.muli %c0_i32_16, %c8_i32 : i32
    %25 = tpu.assume_multiple %24, 8 : i32
    %26 = arith.index_cast %25 : i32 to index
    %c128_17 = arith.constant 128 : index
    %27 = vector.load %arg8[%26, %c128_17] : memref<8x384xbf16, #tpu.memory_space<vmem>>, vector<8x128xbf16>
    %28 = arith.index_cast %25 : i32 to index
    %c256 = arith.constant 256 : index
    %29 = vector.load %arg8[%28, %c256] : memref<8x384xbf16, #tpu.memory_space<vmem>>, vector<8x128xbf16>
    %cst_18 = arith.constant dense<0.000000e+00> : vector<8x8xf32>
    %30 = tpu.matmul %22, %27, %cst_18 {dimension_numbers = #tpu.dot_dimension_numbers<[1], [1], [0], [0], [0, 0, 1, 0], [], []>} : vector<8x128xbf16>, vector<8x128xbf16>, vector<8x8xf32> -> vector<8x8xf32>
    %cst_19 = arith.constant dense<0xFF800000> : vector<8xf32>
    %31 = vector.multi_reduction <maximumf>, %30, %cst_19 [0] : vector<8x8xf32> to vector<8xf32>
    %32 = vector.shape_cast %31 : vector<8xf32> to vector<1x8xf32>
    %33 = vector.broadcast %32 : vector<1x8xf32> to vector<8x8xf32>
    %34 = arith.subf %30, %33 : vector<8x8xf32>
    %35 = math.exp %34 : vector<8x8xf32>
    %cst_20 = arith.constant dense<0.000000e+00> : vector<8xf32>
    %36 = vector.multi_reduction <add>, %35, %cst_20 [0] : vector<8x8xf32> to vector<8xf32>
    %37 = vector.shape_cast %36 : vector<8xf32> to vector<1x8xf32>
    %38 = tpu.reciprocal %37 : vector<1x8xf32> -> vector<1x8xf32>
    %39 = vector.broadcast %38 : vector<1x8xf32> to vector<8x8xf32>
    %40 = arith.mulf %35, %39 : vector<8x8xf32>
    %41 = arith.truncf %40 : vector<8x8xf32> to vector<8x8xbf16>
    %cst_21 = arith.constant dense<0.000000e+00> : vector<8x128xf32>
    %42 = tpu.matmul %41, %29, %cst_21 {dimension_numbers = #tpu.dot_dimension_numbers<[1], [0], [0], [1], [0, 0, 1, 1], [], []>} : vector<8x8xbf16>, vector<8x128xbf16>, vector<8x128xf32> -> vector<8x128xf32>
    %43 = arith.addf %23, %42 : vector<8x128xf32>
    %c1_i32 = arith.constant 1 : i32
    %c0_22 = arith.constant 0 : index
    %c0_23 = arith.constant 0 : index
    %44 = vector.load %arg9[%c0_22, %c0_23] : memref<8x128xf32, #tpu.memory_space<vmem>>, vector<8x128xf32>
    %45 = arith.truncf %43 : vector<8x128xf32> to vector<8x128xbf16>
    %c0_24 = arith.constant 0 : index
    %c0_25 = arith.constant 0 : index
    %c0_26 = arith.constant 0 : index
    %46 = vector.load %arg5[%c0_24, %c0_25, %c0_26] : memref<1x128x128xbf16, #tpu.memory_space<vmem>>, vector<1x128x128xbf16>
    %47 = vector.shape_cast %46 : vector<1x128x128xbf16> to vector<128x128xbf16>
    %cst_27 = arith.constant dense<0.000000e+00> : vector<8x128xf32>
    %48 = tpu.matmul %45, %47, %cst_27 {dimension_numbers = #tpu.dot_dimension_numbers<[1], [0], [0], [1], [0, 0, 1, 1], [], []>} : vector<8x128xbf16>, vector<128x128xbf16>, vector<8x128xf32> -> vector<8x128xf32>
    %49 = arith.addf %44, %48 : vector<8x128xf32>
    %c0_28 = arith.constant 0 : index
    %c0_29 = arith.constant 0 : index
    %50 = vector.load %arg9[%c0_28, %c0_29] : memref<8x128xf32, #tpu.memory_space<vmem>>, vector<8x128xf32>
    tpu.vector_store %arg9[%c0_28, %c0_29], %49 {strides = array<i32>} : memref<8x128xf32, #tpu.memory_space<vmem>>, vector<8x128xf32>,
    %c3_i32 = arith.constant 3 : i32
    %51 = arith.cmpi eq, %arg1, %c3_i32 : i32
    %52 = arith.extui %51 : i1 to i32
    %c0_i32_30 = arith.constant 0 : i32
    %53 = arith.cmpi ne, %52, %c0_i32_30 : i32
    scf.if %53 {
      %c0_31 = arith.constant 0 : index
      %c0_32 = arith.constant 0 : index
      %54 = vector.load %arg9[%c0_31, %c0_32] : memref<8x128xf32, #tpu.memory_space<vmem>>, vector<8x128xf32>
      %c0_33 = arith.constant 0 : index
      %c0_34 = arith.constant 0 : index
      %55 = vector.load %arg6[%c0_33, %c0_34] : memref<1x128xf32, #tpu.memory_space<vmem>>, vector<1x128xf32>
      %56 = vector.shape_cast %55 : vector<1x128xf32> to vector<128xf32>
      %57 = vector.shape_cast %56 : vector<128xf32> to vector<1x128xf32>
      %58 = vector.broadcast %57 : vector<1x128xf32> to vector<8x128xf32>
      %59 = arith.addf %54, %58 : vector<8x128xf32>
      %c0_35 = arith.constant 0 : index
      %c0_36 = arith.constant 0 : index
      %c0_37 = arith.constant 0 : index
      %60 = vector.load %arg7[%c0_35, %c0_36, %c0_37] : memref<1x8x128xf32, #tpu.memory_space<vmem>>, vector<1x8x128xf32>
      %61 = vector.shape_cast %60 : vector<1x8x128xf32> to vector<8x128xf32>
      %62 = vector.shape_cast %59 : vector<8x128xf32> to vector<1x8x128xf32>
      tpu.vector_store %arg7[%c0_35, %c0_36, %c0_37], %62 {strides = array<i32>} : memref<1x8x128xf32, #tpu.memory_space<vmem>>, vector<1x8x128xf32>,
    } else {
    }
    return
  }
  func.func @transform_0(%arg0: i32, %arg1: i32) -> (i32, i32, i32) {
    %c0_i32 = arith.constant 0 : i32
    %c0_i32_0 = arith.constant 0 : i32
    %c0_i32_1 = arith.constant 0 : i32
    return %arg0, %c0_i32, %c0_i32_0 : i32, i32, i32
  }
  func.func @transform_1(%arg0: i32, %arg1: i32) -> (i32, i32, i32) {
    %c0_i32 = arith.constant 0 : i32
    %c0_i32_0 = arith.constant 0 : i32
    %c0_i32_1 = arith.constant 0 : i32
    return %arg1, %c0_i32, %c0_i32_0 : i32, i32, i32
  }
  func.func @transform_2(%arg0: i32, %arg1: i32) -> (i32, i32, i32) {
    %c0_i32 = arith.constant 0 : i32
    %c0_i32_0 = arith.constant 0 : i32
    %c0_i32_1 = arith.constant 0 : i32
    return %arg1, %c0_i32, %c0_i32_0 : i32, i32, i32
  }
  func.func @transform_3(%arg0: i32, %arg1: i32) -> (i32, i32, i32) {
    %c0_i32 = arith.constant 0 : i32
    %c0_i32_0 = arith.constant 0 : i32
    %c0_i32_1 = arith.constant 0 : i32
    return %arg1, %c0_i32, %c0_i32_0 : i32, i32, i32
  }
  func.func @transform_4(%arg0: i32, %arg1: i32) -> (i32, i32) {
    %c0_i32 = arith.constant 0 : i32
    %c0_i32_0 = arith.constant 0 : i32
    %c0_i32_1 = arith.constant 0 : i32
    return %c0_i32, %c0_i32_0 : i32, i32
  }
  func.func @transform_5(%arg0: i32, %arg1: i32) -> (i32, i32, i32) {
    %c0_i32 = arith.constant 0 : i32
    %c0_i32_0 = arith.constant 0 : i32
    %c0_i32_1 = arith.constant 0 : i32
    return %arg0, %c0_i32, %c0_i32_0 : i32, i32, i32
  }
}

</mosaic_0001>

<bundles_post_ra>
// kernel: tpu_custom_call.1
= control target key start
LH: loop header
LB: loop body
LE: loop exit
PB: predicated region body
PF: predicated region fallthrough
CT: control target
= control target key end

     0   :  { %s1899_s0 = inlined_call_operand.hbm [shape: f32[2,8,32], index: 0, kind: input, shape index: {}]   ;;  %s1900_s1 = inlined_call_operand.hbm [shape: bf16[4,32,384], index: 1, kind: input, shape index: {}]   ;;  %s1901_s2 = inlined_call_operand.hbm [shape: f32[4,1,384], index: 2, kind: input, shape index: {}]   ;;  %s1902_s3 = inlined_call_operand.hbm [shape: bf16[4,128,128], index: 3, kind: input, shape index: {}]   ;;  %s1903_s4 = inlined_call_operand.vmem [shape: f32[1,128], index: 4, kind: input, shape index: {}]   ;;  %s1904_s5 = inlined_call_operand.hbm [shape: f32[2,8,128], index: 5, kind: output, shape index: {}]  }
   0x1   :  { %1920 = sst [smem:[#allocation26_spill]] %s1900_s1 }
   0x2   :  { %1921 = sst [smem:[#allocation27_spill]] %s1903_s4 }
   0x3   :  { %1922 = sst [smem:[#allocation28_spill]] %s1904_s5 }
   0x4   :  { %10 = vsyncpa [#allocation5], 0 }
   0x5   :  { %12 = vsyncpa [#allocation5 + $0x1], 0 }
   0x6   :  { %13 = vsyncpa [#allocation8], 0 }
   0x7   :  { %15 = vsyncpa [#allocation8 + $0x1], 0 }
   0x8   :  { %16 = vsyncpa [#allocation11], 0 }
   0x9   :  { %18 = vsyncpa [#allocation11 + $0x1], 0 }
   0xa   :  { %19 = vsyncpa [#allocation6], 0 }
   0xb   :  { %21 = vsyncpa [#allocation6 + $0x1], 0  ;;  %s1470_s18 = smov 0   ;;  %s1472_s19 = smov 0  }
   0xc   :  { %s1474_s20 = smov 0   ;;  %s1476_s21 = smov 0  }
   0xd   :  { %s1478_s22 = smov 0   ;;  %s1480_s23 = smov 0  }
   0xe   :  { %s1482_s24 = smov 0   ;;  %s1484_s25 = smov 0  }
   0xf   :  { %s1486_s26 = smov 0   ;;  %s1488_s27 = smov 0  }
  0x10   :  { %s1490_s28 = smov 0  }
  0x11 LB: > { %1923 = sst [smem:[#allocation17_spill]] %s1393_s20  ;;  %p1906_p0 = scmp.eq.s32.totalorder %s1425_s28, 0  ;;  %s1425_s28 = sphi %s1490_s28, %s27_s28   ;;  %s1421_s27 = sphi %s1488_s27, %s1962_s27   ;;  %s1417_s26 = sphi %s1486_s26, %s1969_s26   ;;  %s1413_s25 = sphi %s1484_s25, %s1968_s25   ;;  %s1409_s24 = sphi %s1482_s24, %s1967_s24   ;;  %s1405_s23 = sphi %s1480_s23, %s1959_s23   ;;  %s1401_s22 = sphi %s1478_s22, %s1966_s22   ;;  %s1397_s21 = sphi %s1476_s21, %s1965_s21   ;;  %s1393_s20 = sphi %s1474_s20, %s1957_s20   ;;  %s1389_s19 = sphi %s1472_s19, %s1964_s19   ;;  %s1385_s18 = sphi %s1470_s18, %s1963_s18  }
  0x12   : > { %1924 = sst [smem:[#allocation18_spill]] %s1405_s23  ;;  %s72_s29 = sadd.s32 1, %s1393_s20 }
  0x13   : > { %1925 = sst [smem:[#allocation19_spill]] %s1413_s25  ;;  %p79_p1 = scmp.ne.s32.totalorder %s1393_s20, %s1389_s19 }
  0x14   : > { %1926 = sst [smem:[#allocation20_spill]] %s1421_s27  ;;  %p1905_p2 = scmp.lt.s32.totalorder %s1425_s28, 8 }
  0x15   : > { %s229_s30 = sand.u32 1, %s1425_s28   ;;  %p81_p3 = por %p79_p1, %p1906_p0 }
  0x16   : > { %s1534_s6 = sand.u32 1, %s1393_s20   ;;  %s1025_s7 = smul.u32 768, %s1417_s26 }
  0x17   : > { %s1024_s8 = smul.u32 48, %s1534_s6  ;;  %p1540_p4 = pnand %p1905_p2, %p81_p3 }
  0x18   : > { %s1928_s1 = sld [smem:[#allocation26_spill]]  ;;  %s1552_s15 = scalar_lea.sflag [#allocation8], %s229_s30 }
  0x19   : > { %s1927_s9 = scalar_select %p1540_p4, 1, 0 }
  0x1a   : > { %s233_s13 = scalar_lea.vmem [#allocation7], %s1024_s8  ;;  %p1558_p7 = pneg %p1540_p4 }
  0x1b   : > { %s240_s14 = sshll.u32 %s233_s13, 4  ;;  %s1549_s14 = int_to_ptr.vmem [resolvable:$true] %s240_s14 }
  0x1e   : > { %s1547_s12 = scalar_lea.hbm %s1928_s1, %s1025_s7  ;;  %s1180_s8 = scalar_lea.hbm %s1928_s1, 3072 }
  0x1f   : > { %s1175_s16 = scalar_lea.hbm %s1547_s12, 768  ;;  %p1181_p10 = scmp.lt.u32.totalorder %s1547_s12, %s1928_s1 }
  0x20   : > { %p1176_p6 = scmp.ne.s32.totalorder %s1547_s12, %s1175_s16  ;;  %p1182_p11 = scmp.lt.u32.totalorder %s1180_s8, %s1175_s16 }
  0x21   : > { %p1184_p13 = scmp.lt.u32.totalorder %s1175_s16, %s1547_s12 }
  0x22   : > { %p1178_p8 = pnand %p1558_p7, %p1176_p6  ;;  %p1183_p12 = por %p1182_p11, %p1181_p10 }
  0x24   : > { %p1179_p9 = pneg %p1178_p8  ;;  %p1185_p1 = por %p1184_p13, %p1183_p12 }
  0x26   : > { %p1186_p3 = pnand %p1185_p1, %p1179_p9 }
  0x28   : > { %1189 = shalt.err (!%p1186_p3)
}
  0x29   : > { %s1190_s30 = scalar_lea.vmem %s1549_s14, 768  ;;  %s1427_s7 = smov [#allocation7]  }
  0x2a   : > { %p1191_p6 = scmp.ne.s32.totalorder %s1549_s14, %s1190_s30  ;;  %s1195_s10 = sshll.u32 %s1427_s7, 4  ;;  %s1196_s10 = int_to_ptr.vmem [resolvable:$false] %s1195_s10 }
  0x2b   : > { %s1197_s11 = scalar_lea.vmem %s1196_s10, 1536  ;;  %p1198_p0 = scmp.lt.s32.totalorder %s1549_s14, %s1196_s10 }
  0x2c   : > { %p1193_p8 = pnand %p1191_p6, %p1558_p7  ;;  %p1199_p5 = scmp.lt.s32.totalorder %s1197_s11, %s1190_s30 }
  0x2e   : > { %p1194_p2 = pneg %p1193_p8  ;;  %p1200_p10 = por %p1199_p5, %p1198_p0 }
  0x30   : > { %p1201_p11 = pnand %p1200_p10, %p1194_p2 }
  0x32   : > { %1204 = shalt.err (!%p1201_p11)
}
  0x33   : > { %s1428_s16 = smov 192   ;;  %s1429_s8 = smov 12  }
  0x34   : > { %1046 = dma.hbm_to_vmem [thread:$0]  (!%p1540_p4), %s1547_s12, 768, %s1549_s14, %s1552_s15, %s1428_s16, %s1428_s16, %s1429_s8  }
  0x35   : > { %p288_p0 = scmp.lt.s32.totalorder %s1425_s28, 9  ;;  %p1930_p2 = scmp.ge.s32.totalorder %s1425_s28, 1 }
  0x36   : > { %s1590_s30 = sadd.s32 4294967295, %s1425_s28   ;;  %s927_s7 = sadd.s32 4294967294, %s1425_s28  }
  0x37   : > { %p1585_p5 = pnand %p1930_p2, %p288_p0  ;;  %s36_s10 = sadd.s32 1, %s1417_s26 }
  0x38   : > { %s39_s11 = sadd.s32 1, %s1421_s27  ;;  %p37_p9 = scmp.ge.s32.totalorder %s36_s10, 4 }
  0x39   : > { %s1931_s13 = scalar_select %p1585_p5, 1, 0 }
  0x3a   : > { %s46_s12 = sadd.s32 1, %s1405_s23  ;;  %p53_p12 = scmp.ne.s32.totalorder %s1405_s23, %s1401_s22 }
  0x3b   : > { %p1909_p13 = scmp.ne.s32.totalorder %s1401_s22, %s1397_s21  ;;  %s1971_s10 = smov (%p37_p9, %s36_s10), 0 }
  0x3c   : > { %1932 = sst [smem:[#allocation21_spill]] %s1971_s10  ;;  %s1973_s11 = smov (!%p37_p9, %s39_s11), %s1421_s27 }
  0x3d   : > { %p1933_p1 = scmp.eq.s32.totalorder %s1425_s28, 0  ;;  %p60_p6 = scmp.eq.s32.totalorder %s1590_s30, 0 }
  0x3e   : > { %p41_p8 = scmp.ge.s32.totalorder %s1973_s11, 2  ;;  %s69_s16 = ssub.s32 %s1417_s26, %s1971_s10 }
  0x3f   : > { %p1608_p3 = por %p1933_p1, %p53_p12  ;;  %p1618_p10 = por %p60_p6, %p1909_p13 }
  0x40   : > { %p70_p11 = scmp.eq.s32.totalorder %s69_s16, 0  ;;  %s1975_s11 = smov (%p41_p8, %s1973_s11), 0 }
  0x41   : > { %s1935_s8 = scalar_select %p1618_p10, 1, 0 }
  0x42   : > { %1936 = sst [smem:[#allocation22_spill]] %s1975_s11  ;;  %s43_s5 = ssub.s32 %s1421_s27, %s1975_s11 }
  0x43   : > { %s1627_s1 = scalar_select %p70_p11, %s1393_s20, %s72_s29  }
  0x44   : > { %p85_p0 = scmp.ne.s32.totalorder %s1389_s19, %s1385_s18  ;;  %p44_p2 = scmp.eq.s32.totalorder %s43_s5, 0 }
  0x45   : > { %1937 = sst [smem:[#allocation23_spill]] %s1627_s1  ;;  %p182_p9 = scmp.eq.s32.totalorder %s1590_s30, 7 }
  0x46   : > { %p1634_p1 = por %p85_p0, %p60_p6  ;;  %p188_p13 = scmp.eq.s32.totalorder %s927_s7, 7 }
  0x47   : > { %s1639_s16 = scalar_select %p44_p2, %s1405_s23, %s46_s12  }
  0x48   : > { %s1938_s10 = scalar_select %p1634_p1, 1, 0 }
  0x49   : > { %1939 = sst [smem:[#allocation24_spill]] %s1639_s16  ;;  %p1644_p8 = por %p182_p9, %p53_p12 }
  0x4a   : > { %p1941_p11 = scmp.ne.s32.totalorder %s1401_s22, %s1397_s21  ;;  %s211_s5 = sand.u32 1, %s1405_s23  }
  0x4b   : > { %s1940_s25 = scalar_select %p1644_p8, 1, 0 }
  0x4c   : > { %p1651_p10 = por %p188_p13, %p1941_p11  ;;  %s931_s18 = sshll.u32 %s1421_s27, 7 }
  0x4d   : > { %s930_s11 = sshll.u32 %s211_s5, 3  ;;  %s1660_s4 = scalar_lea.hbm %s1899_s0, %s931_s18 }
  0x4e   : > { %s1942_s29 = scalar_select %p1651_p10, 1, 0 }
  0x4f   : > { %s215_s7 = scalar_lea.vmem [#allocation4], %s930_s11  ;;  %p1944_p12 = scmp.lt.s32.totalorder %s1425_s28, 8 }
  0x50   : > { %1943 = sst [smem:[#allocation25_spill]] %s1942_s29  ;;  %s222_s12 = sshll.u32 %s215_s7, 4  ;;  %s1670_s12 = int_to_ptr.vmem [resolvable:$true] %s222_s12 }
  0x51   : > { %p1666_p13 = pnand %p1944_p12, %p1608_p3  ;;  %s1026_s27 = smul.u32 3, %s1534_s6 }
  0x52   : > { %s1027_s1 = smul.u32 48, %s1417_s26  ;;  %s212_s20 = scalar_lea.sflag [#allocation5], %s211_s5 }
  0x53   : > { %s1205_s18 = scalar_lea.hbm %s1660_s4, 128  ;;  %p1207_p0 = pneg %p1666_p13 }
  0x54   : > { %p1206_p6 = scmp.ne.s32.totalorder %s1660_s4, %s1205_s18  ;;  %s1210_s7 = scalar_lea.hbm %s1899_s0, 256 }
  0x55   : > { %p1211_p3 = scmp.lt.u32.totalorder %s1660_s4, %s1899_s0  ;;  %p1212_p11 = scmp.lt.u32.totalorder %s1210_s7, %s1205_s18 }
  0x56   : > { %p1208_p2 = pnand %p1207_p0, %p1206_p6  ;;  %p1214_p10 = scmp.lt.u32.totalorder %s1205_s18, %s1660_s4 }
  0x57   : > { %p1213_p12 = por %p1212_p11, %p1211_p3 }
  0x58   : > { %p1209_p9 = pneg %p1208_p2 }
  0x59   : > { %p1215_p8 = por %p1214_p10, %p1213_p12 }
  0x5b   : > { %p1216_p1 = pnand %p1215_p8, %p1209_p9 }
  0x5d   : > { %1219 = shalt.err (!%p1216_p1)
}
  0x5e   : > { %s1220_s5 = scalar_lea.vmem %s1670_s12, 128  ;;  %s1430_s11 = smov [#allocation4]  }
  0x5f   : > { %p1221_p6 = scmp.ne.s32.totalorder %s1670_s12, %s1220_s5  ;;  %s1225_s14 = sshll.u32 %s1430_s11, 4  ;;  %s1226_s14 = int_to_ptr.vmem [resolvable:$false] %s1225_s14 }
  0x60   : > { %s1227_s23 = scalar_lea.vmem %s1226_s14, 256  ;;  %p1228_p4 = scmp.lt.s32.totalorder %s1670_s12, %s1226_s14 }
  0x61   : > { %p1223_p2 = pnand %p1221_p6, %p1207_p0  ;;  %p1229_p3 = scmp.lt.s32.totalorder %s1227_s23, %s1220_s5 }
  0x63   : > { %p1224_p5 = pneg %p1223_p2  ;;  %p1230_p11 = por %p1229_p3, %p1228_p4 }
  0x65   : > { %p1231_p10 = pnand %p1230_p11, %p1224_p5 }
  0x67   : > { %1234 = shalt.err (!%p1231_p10)
}
  0x68   : > { %1043 = dma.hbm_to_vmem [thread:$0]  (!%p1666_p13), %s1660_s4, 128, %s1670_s12, %s212_s20  }
  0x69   : > { %s1704_s7 = scalar_lea.hbm %s1901_s2, %s1027_s1  ;;  %s254_s5 = scalar_lea.vmem [#allocation9], %s1026_s27 }
  0x6a   : > { %s262_s16 = sshll.u32 %s254_s5, 4  ;;  %s934_s11 = sshll.u32 %s1534_s6, 6  ;;  %s263_s16 = int_to_ptr.vmem [resolvable:$true] %s262_s16 }
  0x6b   : > { %s1235_s14 = scalar_lea.hbm %s1704_s7, 48  ;;  %s1240_s20 = scalar_lea.hbm %s1901_s2, 192 }
  0x6c   : > { %p1236_p4 = scmp.ne.s32.totalorder %s1704_s7, %s1235_s14  ;;  %p1241_p8 = scmp.lt.u32.totalorder %s1704_s7, %s1901_s2 }
  0x6d   : > { %p1242_p13 = scmp.lt.u32.totalorder %s1240_s20, %s1235_s14  ;;  %p1244_p9 = scmp.lt.u32.totalorder %s1235_s14, %s1704_s7 }
  0x6e   : > { %p1238_p5 = pnand %p1236_p4, %p1558_p7 }
  0x6f   : > { %p1243_p0 = por %p1242_p13, %p1241_p8 }
  0x70   : > { %p1239_p1 = pneg %p1238_p5 }
  0x71   : > { %p1245_p12 = por %p1244_p9, %p1243_p0 }
  0x73   : > { %p1246_p6 = pnand %p1245_p12, %p1239_p1 }
  0x75   : > { %1249 = shalt.err (!%p1246_p6)
}
  0x76   : > { %s1250_s27 = scalar_lea.vmem %s263_s16, 48  ;;  %s1431_s29 = smov [#allocation9]  }
  0x77   : > { %p1251_p2 = scmp.ne.s32.totalorder %s263_s16, %s1250_s27  ;;  %s1255_s18 = sshll.u32 %s1431_s29, 4  ;;  %s1256_s18 = int_to_ptr.vmem [resolvable:$false] %s1255_s18 }
  0x78   : > { %s1257_s5 = scalar_lea.vmem %s1256_s18, 96  ;;  %p1258_p10 = scmp.lt.s32.totalorder %s263_s16, %s1256_s18 }
  0x79   : > { %p1253_p3 = pnand %p1251_p2, %p1558_p7  ;;  %p1259_p4 = scmp.lt.s32.totalorder %s1257_s5, %s1250_s27 }
  0x7b   : > { %p1254_p11 = pneg %p1253_p3  ;;  %p1260_p5 = por %p1259_p4, %p1258_p10 }
  0x7d   : > { %p1261_p8 = pnand %p1260_p5, %p1254_p11 }
  0x7f   : > { %1264 = shalt.err (!%p1261_p8)
}
  0x80   : > { %p1946_p13 = scmp.ne.s32.totalorder %s1927_s9, 0  ;;  %s966_s14 = sshll.u32 %s1417_s26, 10 }
  0x81   : > { %s1731_s20 = scalar_lea.hbm %s1902_s3, %s966_s14  ;;  %s273_s1 = scalar_lea.vmem [#allocation10], %s934_s11 }
  0x82   : > { %1049 = dma.hbm_to_vmem [thread:$0]  (!%p1946_p13), %s1704_s7, 48, %s263_s16, %s1552_s15  }
  0x83   : > { %s280_s23 = sshll.u32 %s273_s1, 4  ;;  %s270_s27 = scalar_lea.sflag [#allocation11], %s1534_s6  ;;  %s1735_s23 = int_to_ptr.vmem [resolvable:$true] %s280_s23 }
  0x84   : > { %s1265_s29 = scalar_lea.hbm %s1731_s20, 1024  ;;  %s1270_s16 = scalar_lea.hbm %s1902_s3, 4096 }
  0x85   : > { %p1266_p1 = scmp.ne.s32.totalorder %s1731_s20, %s1265_s29  ;;  %p1271_p12 = scmp.lt.u32.totalorder %s1731_s20, %s1902_s3 }
  0x86   : > { %p1272_p6 = scmp.lt.u32.totalorder %s1270_s16, %s1265_s29  ;;  %p1274_p3 = scmp.lt.u32.totalorder %s1265_s29, %s1731_s20 }
  0x87   : > { %p1268_p0 = pnand %p1266_p1, %p1558_p7 }
  0x88   : > { %p1273_p2 = por %p1272_p6, %p1271_p12 }
  0x89   : > { %p1269_p9 = pneg %p1268_p0 }
  0x8a   : > { %p1275_p11 = por %p1274_p3, %p1273_p2 }
  0x8c   : > { %p1276_p10 = pnand %p1275_p11, %p1269_p9 }
  0x8e   : > { %1279 = shalt.err (!%p1276_p10)
}
  0x8f   : > { %s1280_s11 = scalar_lea.vmem %s1735_s23, 1024  ;;  %s1432_s14 = smov [#allocation10]  }
  0x90   : > { %p1281_p4 = scmp.ne.s32.totalorder %s1735_s23, %s1280_s11  ;;  %s1285_s4 = sshll.u32 %s1432_s14, 4  ;;  %s1286_s4 = int_to_ptr.vmem [resolvable:$false] %s1285_s4 }
  0x91   : > { %s1287_s12 = scalar_lea.vmem %s1286_s4, 2048  ;;  %p1288_p1 = scmp.lt.s32.totalorder %s1735_s23, %s1286_s4 }
  0x92   : > { %p1283_p5 = pnand %p1281_p4, %p1558_p7  ;;  %p1289_p0 = scmp.lt.s32.totalorder %s1287_s12, %s1280_s11 }
  0x94   : > { %p1284_p8 = pneg %p1283_p5  ;;  %p1290_p12 = por %p1289_p0, %p1288_p1 }
  0x96   : > { %p1291_p6 = pnand %p1290_p12, %p1284_p8 }
  0x98   : > { %1294 = shalt.err (!%p1291_p6)
}
  0x99   : > { %s1433_s1 = smov 64   ;;  %s1434_s29 = smov 4  }
  0x9a   : > { %1052 = dma.hbm_to_vmem [thread:$0]  (!%p1946_p13), %s1731_s20, 1024, %s1735_s23, %s270_s27, %s1433_s1, %s1433_s1, %s1434_s29  }
  0x9b   : > { %p1947_p7 = scmp.ne.s32.totalorder %s1931_s13, 0 }
  0x9c   : > { %s1764_s17 = sand.u32 (!%p1947_p7), 1, %s1401_s22   ;;  %p1948_p9 = scmp.ne.s32.totalorder (!%p1947_p7), %s1935_s8, 0 }
  0x9d   : > { %292 = sbr.rel (%p1947_p7) target bundleno = 1165 (0x48d), region = 40  ;;  %s938_s15 = sshll.u32 (!%p1947_p7), %s1764_s17, 3 }
  0x9e   : > { %s295_s7 = scalar_lea.sflag (!%p1947_p7), [#allocation5], %s1764_s17  ;;  %s1768_s16 = scalar_lea.vmem (!%p1947_p7), [#allocation4], %s938_s15 }
  0xa4   : > { %1368 = dma.done.wait (%p1948_p9), %s295_s7, 128  }
  0xa5   : > { %1370 = vsyncadd (%p1948_p9), %s295_s7, 4294967168  ;;  %s303_s6 = sand.u32 1, %s1590_s30   ;;  %s305_s9 = sand.u32 1, %s1389_s19  }
  0xa6   : > { %s1028_s13 = smul.u32 48, %s305_s9  ;;  %s304_s20 = scalar_lea.sflag [#allocation8], %s303_s6 }
  0xa7   : > { %p1949_p13 = scmp.ne.s32.totalorder %s1938_s10, 0 }
  0xa8   : > { %s1776_s23 = scalar_lea.vmem [#allocation7], %s1028_s13 }
  0xa9   : > { %1372 = dma.done.wait (%p1949_p13), %s304_s20, 816  }
  0xaa   : > { %1374 = vsyncadd (%p1949_p13), %s304_s20, 4294966480  ;;  %s1029_s27 = smul.u32 3, %s305_s9  ;;  %s939_s18 = sshll.u32 %s305_s9, 6 }
  0xab   : > { %s322_s8 = scalar_lea.sflag [#allocation11], %s305_s9  ;;  %s1784_s11 = scalar_lea.vmem [#allocation10], %s939_s18 }
  0xac   : > { %s1782_s5 = scalar_lea.vmem [#allocation9], %s1029_s27 }
  0xad   : > { %1376 = dma.done.wait (%p1949_p13), %s322_s8, 1024  }
  0xae   : > { %1378 = vsyncadd (%p1949_p13), %s322_s8, 4294966272  ;;  %s1790_s30 = scalar_lea.vmem [#allocation12], %s938_s15  ;;  %p941_p2 = scmp.ne.s32.totalorder %s1409_s24, 0 }
  0xaf   : > { %v1435_v0 = vmov (!%p941_p2), 0.0  }
  0xb0   : > { %371 = sbr.rel (%p941_p2) target bundleno = 183 (0xb7), region = 60  ;;  %372 = vst [vmem:[#allocation3] sm:$0xff] (!%p941_p2), %v1435_v0 }
  0xb7 PF: > { %v1155_v1 = vld [vmem:[%s1776_s23 + $0x4] ss:$12 sps:$4 sm:$0xff]   ;;  %v1157_v2 = vld [vmem:[%s1776_s23] ss:$12 sps:$4 sm:$0xff]   ;;  %v1436_v3 = vmov 0   ;;  %v1437_v6 = vmov 0.0   ;;  %v385_v11 = vlaneseq }
  0xb8   : > { %468 = vmatprep.mubr.bf16.mxu1 %v1436_v3  ;;  %436 = vmatprep.subr.bf16.mxu1 %v1155_v1  ;;  %v1158_v4 = vld [vmem:[%s1776_s23 + $0x1c] ss:$12 sps:$4 sm:$0xff]   ;;  %v1160_v5 = vld [vmem:[%s1776_s23 + $0x18] ss:$12 sps:$4 sm:$0xff]   ;;  %vm1438_vm0 = vmmov 0   ;;  %vm432_vm1 = vcmask 261120  }
  0xb9   : > { %1004 = vmatprep.subr.bf16.mxu0 %v1437_v6  ;;  %437 = vmatpush1.bf16.msra.mxu1 %v1157_v2  ;;  %v373_v7 = vld [vmem:[%s1768_s16] sm:$0xff]  ;;  %v386_v12 = vshrl.u32 %v385_v11, 7  ;;  %v383_v14 = vld [vmem:[%s1782_s5] sm:$0x7]  ;;  %vm599_vm2 = vcmask 1043456   ;;  %v1163_v38 = vld [vmem:[%s1784_s11] sm:$0xff]  }
  0xba   : > { %1020 = vmatprep.mubr.msk.bf16.mxu0 %vm1438_vm0, %v1437_v6  ;;  %438 = vmatprep.subr.bf16.mxu1 %v1158_v4  ;;  %v1161_v8 = vld [vmem:[%s1776_s23 + $0x8] ss:$12 sps:$4 sm:$0xff]   ;;  %v374_v9 = vpack.c.bf16 %v373_v7, %v373_v7  ;;  %v1162_v10 = vld [vmem:[%s1776_s23 + $0x20] ss:$12 sps:$4 sm:$0xff]   ;;  %vm575_vm3 = vcmask 64512   ;;  %p960_p3 = scmp.ne.s32.totalorder %s1409_s24, 3 }
  0xbb   : > { %v387_v13 = vsub.s32 0, %v386_v12  ;;  %v391_v18 = vsub.s32 1, %v386_v12  ;;  %v395_v20 = vsub.s32 2, %v386_v12  ;;  %1005 = vmatpush3.bf16.msra.mxu0 %v1163_v38  ;;  %v1164_v39 = vld [vmem:[%s1784_s11 + $0x8] sm:$0xff]   ;;  %v1165_v40 = vld [vmem:[%s1784_s11 + $0x10] sm:$0xff]   ;;  %v1166_v41 = vld [vmem:[%s1784_s11 + $0x18] sm:$0xff]  }
  0xbc   : > { %1006 = vmatprep.subr.bf16.mxu0 %v1437_v6  ;;  %v1167_v42 = vld [vmem:[%s1784_s11 + $0x20] sm:$0xff]   ;;  %v1168_v43 = vld [vmem:[%s1784_s11 + $0x28] sm:$0xff]   ;;  %v1169_v44 = vld [vmem:[%s1784_s11 + $0x30] sm:$0xff]   ;;  %s1950_s4 = sld [smem:[#allocation27_spill]] (!%p960_p3) }
  0xbd   : > { %439 = vmatpush1.bf16.msra.mxu1 %v1160_v5  ;;  %v388_v15 = vrot.slane %v383_v14, %v387_v13  ;;  %v392_v25 = vrot.slane %v383_v14, %v391_v18  ;;  %v396_v26 = vrot.slane %v383_v14, %v395_v20  ;;  %v1170_v5 = vld [vmem:[%s1784_s11 + $0x38] sm:$0xff]   ;;  %v643_v11 = vld [vmem:[#allocation3] sm:$0xff] }
  0xbe   : > { %984 = vmatprep.subr.bf16.mxu1 %v1437_v6 }
  0xbf   : > { %1007 = vmatpush3.bf16.msra.mxu0 %v1164_v39 }
  0xc0   : > { %948 = vmatmul.mubr.msk.bf16.vlgmr.msra.gmra.mrb[0].mxu1 %vm432_vm1, %v374_v9  ;;  %1008 = vmatprep.subr.bf16.mxu0 %v1437_v6 }
  0xc1   : > { %985 = vmatpush3.bf16.msra.mxu1 %v1161_v8  ;;  %988 = vmatprep.mubr.msk.bf16.mxu1 %vm1438_vm0, %v1437_v6 }
  0xc2   : > { %986 = vmatprep.subr.bf16.mxu1 %v1437_v6  ;;  %v961_v18 = vld [vmem:[%s1950_s4] ss:$0 sm:$0xff] (!%p960_p3) }
  0xc3   : > { %1009 = vmatpush3.bf16.msra.mxu0 %v1165_v40 }
  0xc4   : > { %1010 = vmatprep.subr.bf16.mxu0 %v1437_v6 }
  0xc5   : > { %987 = vmatpush3.bf16.msra.mxu1 %v1162_v10 }
  0xc6   : > { %992 = vmatprep.subr.bf16.mxu1 %v1437_v6 }
  0xc7   : > { %1011 = vmatpush3.bf16.msra.mxu0 %v1166_v41 }
  0xc8   : > { %989 = vmatmul.mubr.msk.bf16.vlgmr.msra.gmra.mrb[4].mxu1 %vm432_vm1, %v374_v9  ;;  %1012 = vmatprep.subr.bf16.mxu0 %v1437_v6 }
  0xc9   : > { %994 = vmatprep.mubr.msk.bf16.mxu1 %vm1438_vm0, %v1437_v6 }
  0xcb   : > { %1013 = vmatpush3.bf16.msra.mxu0 %v1167_v42 }
  0xcc   : > { %1014 = vmatprep.subr.bf16.mxu0 %v1437_v6 }
  0xcf   : > { %1015 = vmatpush3.bf16.msra.mxu0 %v1168_v43 }
  0xd0   : > { %1016 = vmatprep.subr.bf16.mxu0 %v1437_v6 }
  0xd3   : > { %1017 = vmatpush3.bf16.msra.mxu0 %v1169_v44 }
  0xd4   : > { %1018 = vmatprep.subr.bf16.mxu0 %v1437_v6 }
  0xd7   : > { %1019 = vmatpush3.bf16.msra.mxu0 %v1170_v5 }
 0x193   : > { %v470_v16 = vpop.f32.mrb[0].mxu1 }
 0x194   : > { %v471_v17 = vadd.f32 %v470_v16, %v388_v15  ;;  %v472_v19 = vpop.f32.mrb[1].mxu1 }
 0x195   : > { %v474_v21 = vpop.f32.mrb[2].mxu1  ;;  %v473_v28 = vadd.f32 %v472_v19, %v392_v25 }
 0x196   : > { %v517_v22 = vmul.f32 0.35355338, %v471_v17  ;;  %v475_v23 = vpop.f32.mrb[3].mxu1 }
 0x198   : > { %v518_v24 = vpack.c.bf16 %v517_v22, %v517_v22 }
 0x19a   : > { %519 = vst [vmem:[#allocation2] sm:$0xf] %v518_v24 }
 0x19b   : > { %v511_v27 = vpop.f32.mrb[4].mxu1 }
 0x19c   : > { %v512_v29 = vadd.f32 %v511_v27, %v396_v26  ;;  %v990_v30 = vpop.f32.mrb[5].mxu1 }
 0x19d   : > { %v514_v31 = vpop.f32.mrb[6].mxu1 }
 0x19e   : > { %v967_v32 = vpack.c.bf16 %v512_v29, %v473_v28  ;;  %v991_v33 = vpop.f32.mrb[7].mxu1 }
 0x1a0   : > { %528 = vst [vmem:[#allocation2 + $0x4] sm:$0xff] %v967_v32 }
 0x1a1   : > { %v529_v36 = vld [vmem:[#allocation2] sm:$0xf] }
 0x1a7   : > { %v533_v34 = vld [vmem:[#allocation2 + $0x4] sm:$0xf]  ;;  %v534_v35 = vld [vmem:[#allocation2 + $0x8] sm:$0xf] }
 0x1a8   : > { %993 = vmatpush3.bf16.xpose.msra.mxu1 %v533_v34  ;;  %v601_v37 = vsel %vm599_vm2, %v534_v35, 0 }
 0x1a9   : > { %998 = vmatprep.subr.bf16.mxu1 %v1437_v6 }
 0x1af   : > { %995 = vmatmul.mubr.bf16.vlgmr.msra.gmra.mrb[8].mxu1 %v529_v36 }
 0x1b0   : > { %999 = vmatpush3.bf16.msra.mxu1 %v601_v37  ;;  %1000 = vmatprep.mubr.msk.bf16.mxu1 %vm1438_vm0, %v1437_v6 }
 0x282   : > { %v569_v45 = vpop.f32.mrb[8].mxu1 }
 0x283   : > { %v576_v46 = vsel %vm575_vm3, %v569_v45, -inf  ;;  %v996_v47 = vpop.f32.mrb[9].mxu1 }
 0x284   : > { %v577_v48 = vrot.slane %v576_v46, 4  ;;  %v572_v49 = vpop.f32.mrb[10].mxu1 }
 0x285   : > { %v997_v50 = vpop.f32.mrb[11].mxu1 }
 0x286   : > { %v578_v51 = vmax.f32 %v576_v46, %v577_v48 }
 0x288   : > { %v579_v52 = vrot.slane %v578_v51, 2 }
 0x28a   : > { %v580_v53 = vmax.f32 %v578_v51, %v579_v52 }
 0x28c   : > { %v581_v54 = vrot.slane %v580_v53, 1 }
 0x28e   : > { %v582_v55 = vmax.f32 %v580_v53, %v581_v54 }
 0x290   : > { %v583_v56 = vsub.f32 %v569_v45, %v582_v55 }
 0x292   : > { %v584_v57 = vmul.f32 1.442695, %v583_v56 }
 0x294   : > { %1171 = vpow2.f32 %v584_v57 }
 0x29e   : > { %v1172_v58 = vpop.eup %1171 }
 0x29f   : > { %v586_v59 = vsel %vm575_vm3, %v1172_v58, 0.0 }
 0x2a0   : > { %v587_v60 = vrot.slane %v586_v59, 4 }
 0x2a2   : > { %v588_v61 = vadd.f32 %v587_v60, %v586_v59 }
 0x2a4   : > { %v589_v62 = vrot.slane %v588_v61, 2 }
 0x2a6   : > { %v590_v63 = vadd.f32 %v589_v62, %v588_v61 }
 0x2a8   : > { %v591_v0 = vrot.slane %v590_v63, 1 }
 0x2aa   : > { %v592_v1 = vadd.f32 %v591_v0, %v590_v63 }
 0x2ac   : > { %1173 = vrcp.f32 %v592_v1 }
 0x2b6   : > { %v1174_v2 = vpop.eup %1173 }
 0x2b7   : > { %v594_v3 = vmul.f32 %v1174_v2, %v1172_v58 }
 0x2b9   : > { %v595_v4 = vpack.c.bf16 %v594_v3, %v594_v3 }
 0x2bb   : > { %1001 = vmatmul.mubr.msk.bf16.vlgmr.msra.gmra.mrb[12].mxu1 %vm575_vm3, %v595_v4 }
 0x38e   : > { %v637_v6 = vpop.f32.mrb[12].mxu1 }
 0x38f   : > { %v644_v7 = vpack.c.bf16 %v637_v6, %v637_v6  ;;  %v1002_v8 = vpop.f32.mrb[13].mxu1 }
 0x390   : > { %v640_v9 = vpop.f32.mrb[14].mxu1 }
 0x391   : > { %v1003_v10 = vpop.f32.mrb[15].mxu1  ;;  %1021 = vmatmul.mubr.bf16.vlgmr.msra.gmra.mrb[0].mxu0 %v644_v7 }
 0x461   : > { %754 = sbr.rel (%p960_p3) target bundleno = 1138 (0x472), region = 64 }
 0x464   : > { %v743_v12 = vpop.f32.mrb[0].mxu0 }
 0x465   : > { %v749_v13 = vadd.f32 %v743_v12, %v643_v11  ;;  %v1022_v14 = vpop.f32.mrb[1].mxu0 }
 0x466   : > { %v746_v15 = vpop.f32.mrb[2].mxu0 }
 0x467   : > { %750 = vst [vmem:[#allocation3] sm:$0xff] %v749_v13  ;;  %v1023_v16 = vpop.f32.mrb[3].mxu0 }
 0x46e   : > { %v755_v17 = vld [vmem:[#allocation3] sm:$0xff] }
 0x46f   : > { %v763_v19 = vadd.f32 %v961_v18, %v755_v17 }
 0x471   : > { %764 = vst [vmem:[%s1790_s30] sm:$0xff] %v763_v19 }
 0x472 PF: > { %s1951_s12 = sld [smem:[#allocation19_spill]]  ;;  %s779_s24 = sshll.u32 %s1790_s30, 4  ;;  %s780_s24 = int_to_ptr.vmem [resolvable:$true] %s779_s24 }
 0x473   : > { %s1952_s7 = sld [smem:[#allocation28_spill]]  ;;  %s766_s6 = scalar_lea.sflag [#allocation6], %s1764_s17 }
 0x474   : > { %s1295_s9 = scalar_lea.vmem %s780_s24, 128  ;;  %p1953_p10 = scmp.ne.s32.totalorder %s1940_s25, 0 }
 0x475   : > { %p1296_p11 = scmp.ne.s32.totalorder %s780_s24, %s1295_s9  ;;  %s1439_s13 = smov [#allocation12]  }
 0x476   : > { %s1299_s20 = sshll.u32 %s1439_s13, 4  ;;  %s1300_s20 = int_to_ptr.vmem [resolvable:$false] %s1299_s20 }
 0x477   : > { %p1297_p4 = pnand %p1296_p11, %p1953_p10  ;;  %s1301_s23 = scalar_lea.vmem %s1300_s20, 256 }
 0x478   : > { %s963_s1 = sshll.u32 %s1951_s12, 7  ;;  %p1302_p8 = scmp.lt.s32.totalorder %s780_s24, %s1300_s20 }
 0x479   : > { %s1841_s16 = scalar_lea.hbm %s1952_s7, %s963_s1  ;;  %p1298_p5 = pneg %p1297_p4 }
 0x47a   : > { %p1303_p1 = scmp.lt.s32.totalorder %s1301_s23, %s1295_s9 }
 0x47c   : > { %p1304_p0 = por %p1303_p1, %p1302_p8 }
 0x47e   : > { %p1305_p12 = pnand %p1304_p0, %p1298_p5 }
 0x480   : > { %1308 = shalt.err (!%p1305_p12)
}
 0x481   : > { %s1309_s17 = scalar_lea.hbm %s1841_s16, 128  ;;  %s1313_s5 = scalar_lea.hbm %s1952_s7, 256 }
 0x482   : > { %p1310_p6 = scmp.ne.s32.totalorder %s1841_s16, %s1309_s17  ;;  %p1314_p13 = scmp.lt.u32.totalorder %s1841_s16, %s1952_s7 }
 0x483   : > { %p1315_p2 = scmp.lt.u32.totalorder %s1313_s5, %s1309_s17  ;;  %p1317_p11 = scmp.lt.u32.totalorder %s1309_s17, %s1841_s16 }
 0x484   : > { %p1311_p7 = pnand %p1310_p6, %p1953_p10 }
 0x485   : > { %p1316_p3 = por %p1315_p2, %p1314_p13 }
 0x486   : > { %p1312_p9 = pneg %p1311_p7 }
 0x487   : > { %p1318_p4 = por %p1317_p11, %p1316_p3 }
 0x489   : > { %p1319_p5 = pnand %p1318_p4, %p1312_p9 }
 0x48b   : > { %1322 = shalt.err (!%p1319_p5)
}
 0x48c   : > { %1038 = dma.vmem_to_hbm [thread:$0]  (%p1953_p10), %s780_s24, 128, %s1841_s16, %s766_s6  }
 0x48d PF: > { %s1954_s30 = sld [smem:[#allocation25_spill]]  ;;  %p1058_p8 = scmp.ge.s32.totalorder %s1425_s28, 2 }
 0x48e   : > { %s791_s10 = sand.u32 1, %s1397_s21  }
 0x48f   : > { %s792_s14 = scalar_lea.sflag [#allocation6], %s791_s10 }
 0x493   : > { %p1955_p1 = scmp.ne.s32.totalorder %s1954_s30, 0 }
 0x495   : > { %p1054_p0 = pnand %p1058_p8, %p1955_p1 }
 0x497   : > { %1380 = dma.done.wait (!%p1054_p0), %s792_s14, 128  }
 0x498   : > { %1382 = vsyncadd (!%p1054_p0), %s792_s14, 4294967168  ;;  %s27_s28 = sadd.s32 1, %s1425_s28   ;;  %s1956_s4 = sld [smem:[#allocation17_spill]] }
 0x499   : > { %p24_p12 = scmp.ge.s32.totalorder %s27_s28, 10   ;;  %s1957_s20 = sld [smem:[#allocation23_spill]] }
 0x49a   : > { %s1958_s25 = sld [smem:[#allocation18_spill]]  ;;  %s1959_s23 = sld [smem:[#allocation24_spill]] }
 0x49b   : > { %s1960_s12 = sld [smem:[#allocation20_spill]]  ;;  %s1961_s1 = sld [smem:[#allocation21_spill]] }
 0x49c   : > { %s1962_s27 = sld [smem:[#allocation22_spill]]  ;;  %s1963_s18 = smov %s1389_s19 }
 0x49d   : > { %s1965_s21 = smov %s1401_s22  ;;  %s1967_s24 = smov %s1417_s26 }
 0x49e   : > { %s1964_s19 = smov %s1956_s4  ;;  %26 = sbr.rel (!%p24_p12) target bundleno = 17 (0x11), region = 131 }
 0x4a0   : > { %s1966_s22 = smov %s1958_s25 }
 0x4a1   : > { %s1968_s25 = smov %s1960_s12  ;;  %s1969_s26 = smov %s1961_s1 }
 0x4a5   :  { %797 = vsyncpa [#allocation5], 1 }
 0x4a6   :  { %799 = vsyncpa [#allocation5 + $0x1], 1 }
 0x4a7   :  { %800 = vsyncpa [#allocation8], 1 }
 0x4a8   :  { %802 = vsyncpa [#allocation8 + $0x1], 1 }
 0x4a9   :  { %803 = vsyncpa [#allocation11], 1 }
 0x4aa   :  { %805 = vsyncpa [#allocation11 + $0x1], 1 }
 0x4ab   :  { %806 = vsyncpa [#allocation6], 1 }
 0x4ac   :  { %808 = vsyncpa [#allocation6 + $0x1], 1 }

</bundles_post_ra>
